<compile_context>
chip_gen: v7x
topology: tpu7x:2x2x1
jax: 0.10.0
libtpu: 0.0.40
codegen_flags: <defaults>
</compile_context>

<pallas_src>
import functools
import math

import jax
import jax.numpy as jnp
from jax import lax
from jax.experimental import pallas as pl
from jax.experimental.pallas import tpu as pltpu


_LANE = 128
_MAX_COL_TILE = 1024     # max lane width per block (two-pass path)
_MAX_ROW_TILE = 4096     # max rows per block
_MAX_FUSED_REPS = 64     # cap on the in-kernel roll-fold unrolling


# --------------------------------------------------------------------------
# Small host-side helpers
# --------------------------------------------------------------------------
def _cdiv(a, b):
    return -(-a // b)


def _sublane(dtype):
    # 8 rows/sublane-group for f32, 16 for bf16, 32 for int8 (dtype-aware tiles).
    return max(8, 32 // jnp.dtype(dtype).itemsize)


@functools.lru_cache(maxsize=None)
def _vmem_plan():
    """(vmem_limit_bytes, per-block f32 working-set budget) for this TPU."""
    cap = 64 * 1024 * 1024                       # conservative default (= v7x physical)
    try:
        info = pltpu.get_tpu_info()
        v = getattr(info, "vmem_capacity_bytes", None)
        if v:
            cap = int(v)
    except Exception:
        pass
    # Leave headroom for compiler-internal scratch; never exceed 112 MiB.
    vmem_limit = max(32 * 1024 * 1024, min(cap * 3 // 4, 112 * 1024 * 1024))
    # Budget is in f32-equivalent bytes per block; the kernels keep roughly
    # 2 double-buffered dtype blocks in + out plus ~2 f32 temporaries alive,
    # so /8 keeps the total comfortably inside vmem_limit.
    block_budget = min(vmem_limit // 8, 16 * 1024 * 1024)
    return int(vmem_limit), int(block_budget)


def _twopass_col_tile(c):
    if c % _LANE != 0:
        return c                                  # whole axis (block == full dim)
    best = _LANE
    for k in range(1, c // _LANE + 1):
        t = k * _LANE
        if c % t == 0 and t <= _MAX_COL_TILE:
            best = t
    return best


def _fused_col_tile(r, c, reps, budget_bytes):
    """Column tile for the single-pass kernel; None if no legal block fits."""
    def fits(t):
        return r * t * 4 <= budget_bytes          # f32 working-set per block

    if reps > 1:
        # Folding the reps copies of each feature needs the full width in-block.
        if reps > _MAX_FUSED_REPS:
            return None
        return c if fits(c) else None
    if c % _LANE != 0:
        return c if fits(c) else None
    cands = [k * _LANE for k in range(c // _LANE, 0, -1) if c % (k * _LANE) == 0]
    fitting = [t for t in cands if fits(t)]
    if not fitting:
        return None
    for t in fitting:                              # prefer >=2 column blocks
        if c // t >= 2:                            # (megacore + pipeline overlap)
            return t
    return fitting[0]


def _choose_row_tile(r, tile_c, dtype, budget_bytes):
    sub = _sublane(dtype)
    cap = max(sub, budget_bytes // (tile_c * 4))
    t = min(cap, _MAX_ROW_TILE, _cdiv(r, sub) * sub)
    return max(sub, (t // sub) * sub)


# --------------------------------------------------------------------------
# Kernels
# --------------------------------------------------------------------------
def _fused_kernel(x_ref, gamma_ref, beta_ref, alpha_ref, o_ref, *,
                  reps, feat, inv_count, epsilon):
    """Single-pass Dice: block holds ALL rows; exact, cancellation-safe stats."""
    x = x_ref[...].astype(jnp.float32)

    def fold(row):
        # Per-column totals -> per-feature totals replicated to every column.
        # Column layout is k*feat + e, so summing rolls by multiples of `feat`
        # sums exactly the columns congruent mod feat (cheap XLU work).
        total = row
        for k in range(1, reps):
            total = total + pltpu.roll(row, shift=k * feat, axis=1)
        return total

    col_sum = jnp.sum(x, axis=0, keepdims=True)
    mean = fold(col_sum) * inv_count
    centered = x - mean
    col_sq = jnp.sum(centered * centered, axis=0, keepdims=True)
    var = fold(col_sq) * inv_count
    scale = gamma_ref[...] * lax.rsqrt(var + epsilon)
    shift = beta_ref[...] - mean * scale
    x_p = jax.nn.sigmoid(x * scale + shift)
    alpha = alpha_ref[...]
    o_ref[...] = (x * (alpha + x_p * (1.0 - alpha))).astype(o_ref.dtype)


def _stats_kernel(x_ref, sum_ref, sq_ref, *, tile_r, rows, ragged, blocks_per_split):
    """Accumulate per-column sum / sum-of-squares over the (inner) row axis."""
    @pl.when(pl.program_id(2) == 0)
    def _():
        sum_ref[...] = jnp.zeros_like(sum_ref)
        sq_ref[...] = jnp.zeros_like(sq_ref)

    x = x_ref[...].astype(jnp.float32)
    if ragged:
        # No host-side padding: mask the rows of the last (ragged) block.
        blk = pl.program_id(0) * blocks_per_split + pl.program_id(2)
        row = blk * tile_r + lax.broadcasted_iota(jnp.int32, x.shape, 0)
        x = jnp.where(row < rows, x, 0.0)
    sum_ref[0] += jnp.sum(x, axis=0, keepdims=True)
    sq_ref[0] += jnp.sum(x * x, axis=0, keepdims=True)


def _apply_kernel(x_ref, sum_ref, sq_ref, gamma_ref, beta_ref, alpha_ref, o_ref, *,
                  inv_count, epsilon):
    """out = x*(alpha + p*(1-alpha)); stats->scale/shift math fused in-kernel."""
    x = x_ref[...].astype(jnp.float32)
    mean = sum_ref[...] * inv_count
    # NOTE: E[x^2] - mean^2 in f32; fine for BN-scale data (documented tradeoff).
    var = jnp.maximum(sq_ref[...] * inv_count - mean * mean, 0.0)
    scale = gamma_ref[...] * lax.rsqrt(var + epsilon)
    shift = beta_ref[...] - mean * scale
    x_p = jax.nn.sigmoid(x * scale + shift)
    alpha = alpha_ref[...]
    o_ref[...] = (x * (alpha + x_p * (1.0 - alpha))).astype(o_ref.dtype)


# --------------------------------------------------------------------------
# pallas_call wrappers
# --------------------------------------------------------------------------
def _dice_fused(x2d, gamma_c, beta_c, alpha_c, reps, feat, count, epsilon,
                tile_c, vmem_limit):
    r, c = x2d.shape
    kernel = functools.partial(_fused_kernel, reps=reps, feat=feat,
                               inv_count=1.0 / count, epsilon=epsilon)
    param_spec = pl.BlockSpec((1, tile_c), lambda j: (0, j))
    return pl.pallas_call(
        kernel,
        out_shape=jax.ShapeDtypeStruct((r, c), x2d.dtype),
        grid=(c // tile_c,),
        in_specs=[pl.BlockSpec((r, tile_c), lambda j: (0, j)),
                  param_spec, param_spec, param_spec],
        out_specs=pl.BlockSpec((r, tile_c), lambda j: (0, j)),
        compiler_params=pltpu.CompilerParams(
            dimension_semantics=("parallel",),
            vmem_limit_bytes=vmem_limit),
    )(x2d, gamma_c, beta_c, alpha_c)


def _dice_stats(x2d, tile_r, tile_c, splits, vmem_limit):
    r, c = x2d.shape
    n_rb = _cdiv(r, tile_r)
    per = n_rb // splits                         # splits always divides n_rb
    kernel = functools.partial(_stats_kernel, tile_r=tile_r, rows=r,
                               ragged=(r % tile_r) != 0, blocks_per_split=per)

    def x_map(p, j, i):
        return (p * per + i, j)

    def acc_map(p, j, i):
        return (p, 0, j)

    return pl.pallas_call(
        kernel,
        out_shape=(jax.ShapeDtypeStruct((splits, 1, c), jnp.float32),
                   jax.ShapeDtypeStruct((splits, 1, c), jnp.float32)),
        grid=(splits, c // tile_c, per),          # reduction (rows) axis last
        in_specs=[pl.BlockSpec((tile_r, tile_c), x_map)],
        out_specs=(pl.BlockSpec((1, 1, tile_c), acc_map),
                   pl.BlockSpec((1, 1, tile_c), acc_map)),
        compiler_params=pltpu.CompilerParams(
            dimension_semantics=("parallel", "parallel", "arbitrary"),
            vmem_limit_bytes=vmem_limit),
    )(x2d)


def _dice_apply(x2d, col_sum, col_sq, gamma_c, beta_c, alpha_c, inv_count, epsilon,
                tile_r, tile_c, vmem_limit):
    r, c = x2d.shape
    n_rb = _cdiv(r, tile_r)
    c_blocks = c // tile_c
    kernel = functools.partial(_apply_kernel, inv_count=inv_count, epsilon=epsilon)

    if c_blocks >= 2 or n_rb == 1:
        # Columns outer: the [1, tile_c] parameter blocks keep the same block
        # index across the inner row axis -> fetched once, not re-DMA'd.
        grid = (c_blocks, n_rb)
        x_map = lambda j, i: (i, j)
        p_map = lambda j, i: (0, j)
    else:
        # Single column block: parameters are constant anyway; put the many
        # row blocks on the outer (parallel) axis for megacore.
        grid = (n_rb, c_blocks)
        x_map = lambda i, j: (i, j)
        p_map = lambda i, j: (0, j)

    param_spec = pl.BlockSpec((1, tile_c), p_map)
    return pl.pallas_call(
        kernel,
        out_shape=jax.ShapeDtypeStruct((r, c), x2d.dtype),
        grid=grid,
        in_specs=[pl.BlockSpec((tile_r, tile_c), x_map),
                  param_spec, param_spec, param_spec, param_spec, param_spec],
        out_specs=pl.BlockSpec((tile_r, tile_c), x_map),
        compiler_params=pltpu.CompilerParams(
            dimension_semantics=("parallel", "parallel"),
            vmem_limit_bytes=vmem_limit),
    )(x2d, col_sum, col_sq, gamma_c, beta_c, alpha_c)


# --------------------------------------------------------------------------
# Host-side orchestration
# --------------------------------------------------------------------------
def _dice_2d(x2d, alpha, gamma, beta, reps, epsilon, *,
             force_two_pass=False, block_budget_bytes=None):
    """Dice on a 2-D view x2d[R, C], C = reps*E (column k*E+e holds feature e)."""
    r, c = x2d.shape
    e = c // reps
    count = r * reps
    vmem_limit, default_budget = _vmem_plan()
    budget = int(block_budget_bytes) if block_budget_bytes else default_budget

    alpha_f = alpha.reshape(-1).astype(jnp.float32)
    gamma_f = gamma.reshape(-1).astype(jnp.float32)
    beta_f = beta.reshape(-1).astype(jnp.float32)
    assert alpha_f.shape == (e,) and gamma_f.shape == (e,) and beta_f.shape == (e,)

    if reps > 1:   # tiny [1, C] per-column parameter rows (host-side, negligible)
        gamma_c = jnp.tile(gamma_f, reps).reshape(1, c)
        beta_c = jnp.tile(beta_f, reps).reshape(1, c)
        alpha_c = jnp.tile(alpha_f, reps).reshape(1, c)
    else:
        gamma_c = gamma_f.reshape(1, c)
        beta_c = beta_f.reshape(1, c)
        alpha_c = alpha_f.reshape(1, c)

    if not force_two_pass:
        tile_c = _fused_col_tile(r, c, reps, budget)
        if tile_c is not None:
            # Single pass: x read from HBM exactly once.
            return _dice_fused(x2d, gamma_c, beta_c, alpha_c, reps, e, count,
                               epsilon, tile_c, vmem_limit)

    # ---------------- two-pass: exact batch statistics for any R -------------
    tile_c = _twopass_col_tile(c)
    tile_r = _choose_row_tile(r, tile_c, x2d.dtype, budget)
    n_rb = _cdiv(r, tile_r)
    c_blocks = c // tile_c
    # With a single column block, split the row reduction into 2 parallel
    # partial accumulators so both TensorCores (v7x) are used.
    splits = 2 if (c_blocks == 1 and n_rb >= 2 and n_rb % 2 == 0) else 1

    part_sum, part_sq = _dice_stats(x2d, tile_r, tile_c, splits, vmem_limit)
    col_sum = jnp.sum(part_sum, axis=(0, 1))      # [c]
    col_sq = jnp.sum(part_sq, axis=(0, 1))
    if reps > 1:
        # Fold the reps lane-copies of each feature, then re-tile per column.
        col_sum = jnp.tile(jnp.sum(col_sum.reshape(reps, e), axis=0), reps)
        col_sq = jnp.tile(jnp.sum(col_sq.reshape(reps, e), axis=0), reps)

    return _dice_apply(x2d, col_sum.reshape(1, c), col_sq.reshape(1, c),
                       gamma_c, beta_c, alpha_c, 1.0 / count, epsilon,
                       tile_r, tile_c, vmem_limit)


def dice_forward(x, alpha, gamma, beta, *, dim=2, epsilon=1e-8,
                 force_two_pass=False, block_budget_bytes=None):
    """Pallas implementation of Dice.forward (training-mode BatchNorm statistics).

    dim == 2: x [batch, emb], alpha [emb].
    dim == 3: x [batch, num_features, emb], alpha [emb, 1] (or [emb]).
    gamma/beta are the BatchNorm1d affine weight/bias ([emb]).
    `force_two_pass` / `block_budget_bytes` are tuning/test overrides.
    """
    # TODO(synk): running_mean/running_var tracking (eval-mode BN) is not modeled;
    # forward uses batch statistics exactly as the PyTorch module does in training.
    assert dim in (2, 3)
    assert x.ndim == dim
    orig_shape = x.shape
    if dim == 2:
        x2d, reps = x, 1
    else:
        b, f, e = x.shape
        x2d, reps = x.reshape(b, f * e), f        # free view; lane axis F*E

    r, c = x2d.shape
    # Lane-dense row folding: when the minor dim is not a multiple of 128, fold
    # g rows into lanes (free view) so loads/stores are unmasked full bursts.
    if c % _LANE != 0:
        g = _LANE // math.gcd(c, _LANE)
        if g > 1 and r % g == 0:
            x2d = x2d.reshape(r // g, g * c)
            reps *= g

    out2d = _dice_2d(x2d, alpha, gamma, beta, reps, epsilon,
                     force_two_pass=force_two_pass,
                     block_budget_bytes=block_budget_bytes)
    return out2d.reshape(orig_shape)


# --------------------------------------------------------------------------
# Pure-JAX reference (mirrors the PyTorch module) + demo
# --------------------------------------------------------------------------
def _dice_reference(x, alpha, gamma, beta, dim, epsilon):
    alpha = alpha.reshape(-1)
    if dim == 2:
        mean = jnp.mean(x, axis=0)
        var = jnp.mean((x - mean) ** 2, axis=0)
        x_hat = (x - mean) * lax.rsqrt(var + epsilon)
        x_p = jax.nn.sigmoid(gamma * x_hat + beta)
        return alpha * (1.0 - x_p) * x + x_p * x
    xt = jnp.swapaxes(x, 1, 2)                    # [B, E, F]
    mean = jnp.mean(xt, axis=(0, 2), keepdims=True)
    var = jnp.mean((xt - mean) ** 2, axis=(0, 2), keepdims=True)
    x_hat = (xt - mean) * lax.rsqrt(var + epsilon)
    g = gamma.reshape(1, -1, 1)
    b = beta.reshape(1, -1, 1)
    a = alpha.reshape(1, -1, 1)
    x_p = jax.nn.sigmoid(g * x_hat + b)
    out = a * (1.0 - x_p) * xt + x_p * xt
    return jnp.swapaxes(out, 1, 2)


if __name__ == "__main__":
    key = jax.random.PRNGKey(0)
    kx2, kx2b, kx2c, kx3, ka, kg, kb, ka2, kg2, kb2 = jax.random.split(key, 10)

    batch, num_features, emb = 8, 4, 32
    epsilon = 1e-8

    gamma = 1.0 + 0.1 * jax.random.normal(kg, (emb,), jnp.float32)
    beta = 0.1 * jax.random.normal(kb, (emb,), jnp.float32)
    alpha1d = 0.25 + 0.1 * jax.random.normal(ka, (emb,), jnp.float32)

    # --- 1) dim == 2, small E (lane-dense row-fold -> fused single pass) -----
    x2 = jax.random.normal(kx2, (batch, emb), jnp.float32)
    dice2 = jax.jit(functools.partial(dice_forward, dim=2, epsilon=epsilon))
    out2 = dice2(x2, alpha1d, gamma, beta)
    jax.block_until_ready(out2)
    ref2 = _dice_reference(x2, alpha1d, gamma, beta, 2, epsilon)
    assert out2.shape == x2.shape
    assert jnp.allclose(out2, ref2, atol=1e-4, rtol=1e-4), "dim=2 folded fused mismatch"

    # --- 2) dim == 2, E multiple of 128 (fused, >=2 column blocks) ------------
    emb_big = 256
    gamma_b = 1.0 + 0.1 * jax.random.normal(kg2, (emb_big,), jnp.float32)
    beta_b = 0.1 * jax.random.normal(kb2, (emb_big,), jnp.float32)
    alpha_b = 0.25 + 0.1 * jax.random.normal(ka2, (emb_big,), jnp.float32)
    x2b = jax.random.normal(kx2b, (16, emb_big), jnp.float32)
    out2b = dice_forward(x2b, alpha_b, gamma_b, beta_b, dim=2, epsilon=epsilon)
    jax.block_until_ready(out2b)
    ref2b = _dice_reference(x2b, alpha_b, gamma_b, beta_b, 2, epsilon)
    assert jnp.allclose(out2b, ref2b, atol=1e-4, rtol=1e-4), "dim=2 fused mismatch"

    # --- 3) dim == 2, forced two-pass with ragged rows + row-split stats ------
    x2c = jax.random.normal(kx2c, (44, emb_big), jnp.float32)
    out2c = dice_forward(x2c, alpha_b, gamma_b, beta_b, dim=2, epsilon=epsilon,
                         force_two_pass=True, block_budget_bytes=8192)
    jax.block_until_ready(out2c)
    ref2c = _dice_reference(x2c, alpha_b, gamma_b, beta_b, 2, epsilon)
    assert jnp.allclose(out2c, ref2c, atol=1e-4, rtol=1e-4), "dim=2 two-pass mismatch"

    # --- 4) dim == 3 (lane-dense F*E, fused with reps-fold) -------------------
    x3 = jax.random.normal(kx3, (batch, num_features, emb), jnp.float32)
    alpha3 = alpha1d.reshape(emb, 1)
    dice3 = jax.jit(functools.partial(dice_forward, dim=3, epsilon=epsilon))
    out3 = dice3(x3, alpha3, gamma, beta)
    jax.block_until_ready(out3)
    ref3 = _dice_reference(x3, alpha3, gamma, beta, 3, epsilon)
    assert out3.shape == x3.shape
    assert jnp.allclose(out3, ref3, atol=1e-4, rtol=1e-4), "dim=3 fused mismatch"

    # --- 5) dim == 3, forced two-pass (host-side reps fold of the stats) ------
    out3_tp = dice_forward(x3, alpha3, gamma, beta, dim=3, epsilon=epsilon,
                           force_two_pass=True)
    jax.block_until_ready(out3_tp)
    assert jnp.allclose(out3_tp, ref3, atol=1e-4, rtol=1e-4), "dim=3 two-pass mismatch"

    print("KERNEL_OK")
</pallas_src>

<mosaic_0001>
module attributes {stable_mosaic.version = 11 : i64} {
  func.func @_fused_kernel(%arg0: i32, %arg1: memref<2x128xf32, #tpu.memory_space<vmem>>, %arg2: memref<1x128xf32, #tpu.memory_space<vmem>>, %arg3: memref<1x128xf32, #tpu.memory_space<vmem>>, %arg4: memref<1x128xf32, #tpu.memory_space<vmem>>, %arg5: memref<2x128xf32, #tpu.memory_space<vmem>>) attributes {dimension_semantics = [#tpu.dimension_semantics<parallel>], iteration_bounds = array<i64: 1>, scalar_prefetch = 0 : i64, scratch_operands = 0 : i64, tpu.core_type = #tpu.core_type<tc>, window_params = [{transform_indices = @transform_0, window_bounds = array<i64: 2, 128>}, {transform_indices = @transform_1, window_bounds = array<i64: 1, 128>}, {transform_indices = @transform_2, window_bounds = array<i64: 1, 128>}, {transform_indices = @transform_3, window_bounds = array<i64: 1, 128>}, {transform_indices = @transform_4, window_bounds = array<i64: 2, 128>}]} {
    %c0 = arith.constant 0 : index
    %c0_0 = arith.constant 0 : index
    %0 = vector.load %arg1[%c0, %c0_0] : memref<2x128xf32, #tpu.memory_space<vmem>>, vector<2x128xf32>
    %cst = arith.constant dense<0.000000e+00> : vector<128xf32>
    %1 = vector.multi_reduction <add>, %0, %cst [0] : vector<2x128xf32> to vector<128xf32>
    %2 = vector.shape_cast %1 : vector<128xf32> to vector<1x128xf32>
    %c32_i32 = arith.constant 32 : i32
    %3 = tpu.dynamic_rotate %2 by %c32_i32 dim 1 : vector<1x128xf32>, i32 -> vector<1x128xf32>
    %4 = arith.addf %2, %3 : vector<1x128xf32>
    %c64_i32 = arith.constant 64 : i32
    %5 = tpu.dynamic_rotate %2 by %c64_i32 dim 1 : vector<1x128xf32>, i32 -> vector<1x128xf32>
    %6 = arith.addf %4, %5 : vector<1x128xf32>
    %c96_i32 = arith.constant 96 : i32
    %7 = tpu.dynamic_rotate %2 by %c96_i32 dim 1 : vector<1x128xf32>, i32 -> vector<1x128xf32>
    %8 = arith.addf %6, %7 : vector<1x128xf32>
    %cst_1 = arith.constant 1.250000e-01 : f32
    %9 = vector.broadcast %cst_1 : f32 to vector<1x128xf32>
    %10 = arith.mulf %8, %9 : vector<1x128xf32>
    %11 = vector.broadcast %10 : vector<1x128xf32> to vector<2x128xf32>
    %12 = arith.subf %0, %11 : vector<2x128xf32>
    %13 = arith.mulf %12, %12 : vector<2x128xf32>
    %cst_2 = arith.constant dense<0.000000e+00> : vector<128xf32>
    %14 = vector.multi_reduction <add>, %13, %cst_2 [0] : vector<2x128xf32> to vector<128xf32>
    %15 = vector.shape_cast %14 : vector<128xf32> to vector<1x128xf32>
    %c32_i32_3 = arith.constant 32 : i32
    %16 = tpu.dynamic_rotate %15 by %c32_i32_3 dim 1 : vector<1x128xf32>, i32 -> vector<1x128xf32>
    %17 = arith.addf %15, %16 : vector<1x128xf32>
    %c64_i32_4 = arith.constant 64 : i32
    %18 = tpu.dynamic_rotate %15 by %c64_i32_4 dim 1 : vector<1x128xf32>, i32 -> vector<1x128xf32>
    %19 = arith.addf %17, %18 : vector<1x128xf32>
    %c96_i32_5 = arith.constant 96 : i32
    %20 = tpu.dynamic_rotate %15 by %c96_i32_5 dim 1 : vector<1x128xf32>, i32 -> vector<1x128xf32>
    %21 = arith.addf %19, %20 : vector<1x128xf32>
    %cst_6 = arith.constant 1.250000e-01 : f32
    %22 = vector.broadcast %cst_6 : f32 to vector<1x128xf32>
    %23 = arith.mulf %21, %22 : vector<1x128xf32>
    %c0_7 = arith.constant 0 : index
    %c0_8 = arith.constant 0 : index
    %24 = vector.load %arg2[%c0_7, %c0_8] : memref<1x128xf32, #tpu.memory_space<vmem>>, vector<1x128xf32>
    %cst_9 = arith.constant 9.99999993E-9 : f32
    %25 = vector.broadcast %cst_9 : f32 to vector<1x128xf32>
    %26 = arith.addf %23, %25 : vector<1x128xf32>
    %27 = math.rsqrt %26 : vector<1x128xf32>
    %28 = arith.mulf %24, %27 : vector<1x128xf32>
    %c0_10 = arith.constant 0 : index
    %c0_11 = arith.constant 0 : index
    %29 = vector.load %arg3[%c0_10, %c0_11] : memref<1x128xf32, #tpu.memory_space<vmem>>, vector<1x128xf32>
    %30 = arith.mulf %10, %28 : vector<1x128xf32>
    %31 = arith.subf %29, %30 : vector<1x128xf32>
    %32 = vector.broadcast %28 : vector<1x128xf32> to vector<2x128xf32>
    %33 = arith.mulf %0, %32 : vector<2x128xf32>
    %34 = vector.broadcast %31 : vector<1x128xf32> to vector<2x128xf32>
    %35 = arith.addf %33, %34 : vector<2x128xf32>
    %36 = arith.negf %35 : vector<2x128xf32>
    %37 = math.exp %36 : vector<2x128xf32>
    %cst_12 = arith.constant 1.000000e+00 : f32
    %38 = vector.broadcast %cst_12 : f32 to vector<2x128xf32>
    %39 = arith.addf %38, %37 : vector<2x128xf32>
    %40 = arith.divf %38, %39 : vector<2x128xf32>
    %c0_13 = arith.constant 0 : index
    %c0_14 = arith.constant 0 : index
    %41 = vector.load %arg4[%c0_13, %c0_14] : memref<1x128xf32, #tpu.memory_space<vmem>>, vector<1x128xf32>
    %cst_15 = arith.constant 1.000000e+00 : f32
    %42 = vector.broadcast %cst_15 : f32 to vector<1x128xf32>
    %43 = arith.subf %42, %41 : vector<1x128xf32>
    %44 = vector.broadcast %43 : vector<1x128xf32> to vector<2x128xf32>
    %45 = arith.mulf %40, %44 : vector<2x128xf32>
    %46 = vector.broadcast %41 : vector<1x128xf32> to vector<2x128xf32>
    %47 = arith.addf %46, %45 : vector<2x128xf32>
    %48 = arith.mulf %0, %47 : vector<2x128xf32>
    %c0_16 = arith.constant 0 : index
    %c0_17 = arith.constant 0 : index
    %49 = vector.load %arg5[%c0_16, %c0_17] : memref<2x128xf32, #tpu.memory_space<vmem>>, vector<2x128xf32>
    tpu.vector_store %arg5[%c0_16, %c0_17], %48 {strides = array<i32>} : memref<2x128xf32, #tpu.memory_space<vmem>>, vector<2x128xf32>,
    return
  }
  func.func @transform_0(%arg0: i32) -> (i32, i32) {
    %c0_i32 = arith.constant 0 : i32
    %c0_i32_0 = arith.constant 0 : i32
    return %c0_i32, %arg0 : i32, i32
  }
  func.func @transform_1(%arg0: i32) -> (i32, i32) {
    %c0_i32 = arith.constant 0 : i32
    %c0_i32_0 = arith.constant 0 : i32
    return %c0_i32, %arg0 : i32, i32
  }
  func.func @transform_2(%arg0: i32) -> (i32, i32) {
    %c0_i32 = arith.constant 0 : i32
    %c0_i32_0 = arith.constant 0 : i32
    return %c0_i32, %arg0 : i32, i32
  }
  func.func @transform_3(%arg0: i32) -> (i32, i32) {
    %c0_i32 = arith.constant 0 : i32
    %c0_i32_0 = arith.constant 0 : i32
    return %c0_i32, %arg0 : i32, i32
  }
  func.func @transform_4(%arg0: i32) -> (i32, i32) {
    %c0_i32 = arith.constant 0 : i32
    %c0_i32_0 = arith.constant 0 : i32
    return %c0_i32, %arg0 : i32, i32
  }
}

</mosaic_0001>

<bundles_post_ra>
// kernel: tile.29
= control target key start
LH: loop header
LB: loop body
LE: loop exit
PB: predicated region body
PF: predicated region fallthrough
CT: control target
= control target key end

     0   :  { %vm7_vm0 = vcmask 261120   ;;  %s37_s8 = smov 32   ;;  %s38_s9 = smov 64   ;;  %vm13_vm1 = vcmask 1048320   ;;  %vm19_vm2 = vcmask 785920   ;;  %vm25_vm3 = vcmask 523520   ;;  %s55_s0 = inlined_call_operand.vmem [shape: f32[4,32], index: 0, kind: input, shape index: {}]   ;;  %s56_s1 = inlined_call_operand.vmem [shape: f32[1,128], index: 1, kind: output, shape index: {}]  }
   0x1   :  { %v4_v0 = vld [vmem:[%s55_s0] sm:$0xf]  ;;  %s36_s0 = smov 96  }
   0x2   :  { %5 = vst [vmem:[#allocation1] sm:$0xf] %v4_v0 }
   0x9   :  { %v10_v1 = vld [vmem:[#allocation1 + $0x3] sm:$0x1]   ;;  %v22_v2 = vld [vmem:[#allocation1 + $0x1] sm:$0x1]   ;;  %v6_v3 = vld [vmem:[#allocation1] sm:$0x1]  }
   0xa   :  { %11 = vrot.lane.b32.xlu0 %v10_v1, %s36_s0  ;;  %23 = vrot.lane.b32.xlu1 %v22_v2, %s37_s8  ;;  %v16_v4 = vld [vmem:[#allocation1 + $0x2] sm:$0x1]   ;;  %8 = vst.msk [vmem:[#allocation0] sm:$0x1] %vm7_vm0, %v6_v3  }
   0xe   :  { %17 = vrot.lane.b32.xlu0 %v16_v4, %s38_s9 }
  0x7c   :  { %v12_v5 = vpop.permute.xlu0 %11   ;;  %v24_v6 = vpop.permute.xlu1 %23  }
  0x7d   :  { %14 = vst.msk [vmem:[#allocation0] sm:$0x1] %vm13_vm1, %v12_v5  }
  0x80   :  { %v18_v7 = vpop.permute.xlu0 %17  }
  0x81   :  { %20 = vst.msk [vmem:[#allocation0] sm:$0x1] %vm19_vm2, %v18_v7  }
  0x82   :  { %26 = vst.msk [vmem:[#allocation0] sm:$0x1] %vm25_vm3, %v24_v6  }
  0x89   :  { %v30_v8 = vld [vmem:[#allocation0] sm:$0x1] }
  0x8a   :  { %32 = vst [vmem:[%s56_s1] sm:$0x1] %v30_v8 }

// kernel: tile.28
= control target key start
LH: loop header
LB: loop body
LE: loop exit
PB: predicated region body
PF: predicated region fallthrough
CT: control target
= control target key end

     0   :  { %s22_s0 = inlined_call_operand.vmem [shape: f32[32], index: 0, kind: input, shape index: {}]   ;;  %s23_s1 = inlined_call_operand.vmem [shape: f32[4,32], index: 1, kind: output, shape index: {}]  }
   0x1   :  { %v4_v0 = vld [vmem:[%s22_s0] ss:$0 sm:$0xff] }
   0x2   :  { %5 = vst [vmem:[%s23_s1] sm:$0xf] %v4_v0 }

// kernel: dice_forward.1
= control target key start
LH: loop header
LB: loop body
LE: loop exit
PB: predicated region body
PF: predicated region fallthrough
CT: control target
= control target key end

     0   :  { %vm18_vm0 = vcmask 1041408   ;;  %s118_s17 = smov 32   ;;  %s119_s18 = smov 96   ;;  %v36_v8 = vlaneseq  ;;  %s169_s0 = inlined_call_operand.vmem [shape: f32[2,128], index: 0, kind: input, shape index: {}]   ;;  %s170_s1 = inlined_call_operand.vmem [shape: f32[1,128], index: 1, kind: input, shape index: {}]   ;;  %s171_s2 = inlined_call_operand.vmem [shape: f32[1,128], index: 2, kind: input, shape index: {}]   ;;  %s172_s3 = inlined_call_operand.vmem [shape: f32[1,128], index: 3, kind: input, shape index: {}]   ;;  %s173_s4 = inlined_call_operand.vmem [shape: f32[2,128], index: 4, kind: output, shape index: {}]  }
   0x1   :  { %v149_v0 = vld [vmem:[%s169_s0] sm:$0x3]  ;;  %s120_s19 = smov 64  }
   0x2   :  { %v19_v1 = vsel %vm18_vm0, %v149_v0, 0.0  ;;  %v37_v11 = vshrl.u32 %v36_v8, 7  ;;  %v59_v36 = vld [vmem:[%s170_s1] sm:$0x1] }
   0x3   :  { %v20_v2 = vrot.slane %v19_v1, 4  ;;  %v63_v39 = vld [vmem:[%s171_s2] sm:$0x1] }
   0x4   :  { %v38_v15 = vsub.s32 0, %v37_v11  ;;  %v86_v49 = vld [vmem:[%s172_s3] sm:$0x1] }
   0x5   :  { %v21_v3 = vadd.f32 %v20_v2, %v19_v1  ;;  %v87_v50 = vsub.f32 1.0, %v86_v49 }
   0x6   :  { %v99_v52 = vrot.slane %v86_v49, %v38_v15 }
   0x7   :  { %v22_v4 = vrot.slane %v21_v3, 2  ;;  %v92_v51 = vrot.slane %v87_v50, %v38_v15 }
   0x9   :  { %v23_v5 = vadd.f32 %v22_v4, %v21_v3 }
   0xb   :  { %v24_v6 = vrot.slane %v23_v5, 1 }
   0xd   :  { %v25_v7 = vadd.f32 %v24_v6, %v23_v5 }
   0xf   :  { %26 = vrot.lane.b32.xlu0 %v25_v7, %s118_s17  ;;  %32 = vrot.lane.b32.xlu1 %v25_v7, %s119_s18 }
  0x13   :  { %29 = vrot.lane.b32.xlu0 %v25_v7, %s120_s19 }
  0x81   :  { %v27_v9 = vpop.permute.xlu0 %26  ;;  %v33_v13 = vpop.permute.xlu1 %32 }
  0x82   :  { %v28_v10 = vadd.f32 %v27_v9, %v25_v7 }
  0x85   :  { %v30_v12 = vpop.permute.xlu0 %29 }
  0x86   :  { %v31_v14 = vadd.f32 %v30_v12, %v28_v10 }
  0x88   :  { %v34_v16 = vadd.f32 %v33_v13, %v31_v14 }
  0x8a   :  { %v35_v17 = vmul.f32 0.125, %v34_v16 }
  0x8c   :  { %v39_v18 = vrot.slane %v35_v17, %v38_v15 }
  0x8e   :  { %v40_v19 = vsub.f32 %v149_v0, %v39_v18 }
  0x90   :  { %v41_v20 = vmul.f32 %v40_v19, %v40_v19 }
  0x92   :  { %v42_v21 = vsel %vm18_vm0, %v41_v20, 0.0 }
  0x93   :  { %v43_v22 = vrot.slane %v42_v21, 4 }
  0x95   :  { %v44_v23 = vadd.f32 %v43_v22, %v42_v21 }
  0x97   :  { %v45_v24 = vrot.slane %v44_v23, 2 }
  0x99   :  { %v46_v25 = vadd.f32 %v45_v24, %v44_v23 }
  0x9b   :  { %v47_v26 = vrot.slane %v46_v25, 1 }
  0x9d   :  { %v48_v27 = vadd.f32 %v47_v26, %v46_v25 }
  0x9f   :  { %52 = vrot.lane.b32.xlu0 %v48_v27, %s120_s19  ;;  %49 = vrot.lane.b32.xlu1 %v48_v27, %s118_s17 }
  0xa3   :  { %55 = vrot.lane.b32.xlu1 %v48_v27, %s119_s18 }
 0x111   :  { %v50_v28 = vpop.permute.xlu1 %49  ;;  %v53_v30 = vpop.permute.xlu0 %52 }
 0x112   :  { %v51_v29 = vadd.f32 %v50_v28, %v48_v27 }
 0x114   :  { %v54_v31 = vadd.f32 %v53_v30, %v51_v29 }
 0x115   :  { %v56_v32 = vpop.permute.xlu1 %55 }
 0x116   :  { %v57_v33 = vadd.f32 %v56_v32, %v54_v31 }
 0x118   :  { %v58_v34 = vmul.f32 0.125, %v57_v33 }
 0x11a   :  { %v60_v35 = vadd.f32 1e-08, %v58_v34 }
 0x11c   :  { %112 = vrsqrt.f32 %v60_v35 }
 0x126   :  { %v113_v37 = vpop.eup %112 }
 0x127   :  { %v62_v38 = vmul.f32 %v113_v37, %v59_v36 }
 0x129   :  { %v64_v40 = vmul.f32 %v62_v38, %v35_v17  ;;  %v70_v41 = vrot.slane %v62_v38, %v38_v15 }
 0x12b   :  { %v65_v42 = vsub.f32 %v63_v39, %v64_v40  ;;  %v72_v43 = vmul.f32 %v70_v41, %v149_v0 }
 0x12d   :  { %v77_v44 = vrot.slane %v65_v42, %v38_v15 }
 0x12f   :  { %v79_v45 = vadd.f32 %v77_v44, %v72_v43 }
 0x131   :  { %v108_v46 = vmul.f32 -1.442695, %v79_v45 }
 0x133   :  { %114 = vpow2.f32 %v108_v46 }
 0x13d   :  { %v115_v47 = vpop.eup %114 }
 0x13e   :  { %v83_v48 = vadd.f32 1.0, %v115_v47 }
 0x140   :  { %116 = vrcp.f32 %v83_v48 }
 0x14a   :  { %v117_v53 = vpop.eup %116 }
 0x14b   :  { %v94_v54 = vmul.f32 %v117_v53, %v92_v51 }
 0x14d   :  { %v101_v55 = vadd.f32 %v99_v52, %v94_v54 }
 0x14f   :  { %v102_v56 = vmul.f32 %v101_v55, %v149_v0 }
 0x151   :  { %103 = vst [vmem:[%s173_s4] sm:$0x3] %v102_v56 }

</bundles_post_ra>
